<compile_context>
chip_gen: v5e
topology: v5e:2x2
jax: 0.10.0
libtpu: 0.0.40
codegen_flags: <defaults>
</compile_context>

<pallas_src>
import jax
import jax.numpy as jnp
from jax.experimental import pallas as pl
from jax.experimental.pallas import tpu as pltpu

LEAKY_SLOPE = 0.01   # nn.LeakyReLU default negative_slope
BN_EPS = 1e-5        # nn.BatchNorm1d default eps


def _vmem_limit_bytes():
    """Scoped-VMEM request: physical capacity minus ~35% headroom for compiler scratch."""
    try:
        cap = pltpu.get_tpu_info().vmem_capacity_bytes
    except Exception:
        cap = 64 * 1024 * 1024
    return int(cap * 0.65)


def _conv_tile(x_ref, wpk_ref):
    """3-tap Conv1d for one batch element as a single MXU contraction.

    x_ref:   (Cin, L) UNPADDED input, time on the lane axis.
    wpk_ref: (Cout, 3*Cin) packed taps, K laid out [k=0 | k=1 | k=2] x Cin.
    returns f32 (Cout, L)
    """
    x = x_ref[...].astype(jnp.float32)                        # (Cin, L)
    cin = x.shape[0]
    z = jnp.zeros((cin, 1), jnp.float32)
    # In-VMEM halo (padding=1): no HBM pad copy, edges zeroed explicitly.
    x_prev = jnp.concatenate([z, x[:, :-1]], axis=1)          # x[t-1], zero at t == 0
    x_next = jnp.concatenate([x[:, 1:], z], axis=1)           # x[t+1], zero at t == L-1
    xs = jnp.concatenate([x_prev, x, x_next], axis=0)         # (3*Cin, L), K stacked k-major
    return jax.lax.dot_general(
        wpk_ref[...].astype(jnp.float32), xs,
        dimension_numbers=(((1,), (0,)), ((), ())),
        preferred_element_type=jnp.float32)                   # (Cout, L)


def conv_stats_kernel(x_ref, wpk_ref, stats_ref):
    """Pass 1: conv -> per-channel partial (sum, sumsq) packed into one (Cout, 2) block."""
    acc = _conv_tile(x_ref, wpk_ref)                          # (Cout, L) f32
    s = jnp.sum(acc, axis=1, keepdims=True)                   # (Cout, 1)
    s2 = jnp.sum(acc * acc, axis=1, keepdims=True)            # (Cout, 1)
    stats_ref[...] = jnp.concatenate([s, s2], axis=1)         # (Cout, 2)


def conv_bn_act_kernel(x_ref, w2_ref, shift_ref, o_ref):
    """Pass 2: conv with BN-scale-folded weights -> `+shift` -> LeakyReLU."""
    acc = _conv_tile(x_ref, w2_ref)                           # (Cout, L) f32, already scaled
    y = acc + shift_ref[...]
    o_ref[...] = jnp.where(y >= 0.0, y, LEAKY_SLOPE * y).astype(o_ref.dtype)


def wave_conv_layer(x_ncl, w_torch, bias, gamma, beta):
    """x_ncl: (N, C_in, L) float32 (PyTorch NCL layout). Returns (N, C_out, L) float32.

    `bias` is accepted for API parity with nn.Conv1d but NOT used: a per-channel constant
    added before training-mode BatchNorm is exactly cancelled by the mean subtraction.
    """
    del bias
    N, Cin, L = x_ncl.shape
    Cout = w_torch.shape[0]

    # Packed taps: wpk[cout, k*Cin + cin] = w_torch[cout, cin, k]  (tiny host-side reshape)
    wpk = jnp.transpose(w_torch, (0, 2, 1)).reshape(Cout, 3 * Cin)

    cparams = pltpu.CompilerParams(
        dimension_semantics=("parallel",),                    # batch axis -> both TCs on v7x
        vmem_limit_bytes=_vmem_limit_bytes())

    x_spec = pl.BlockSpec((None, Cin, L), lambda n: (n, 0, 0))      # unpadded, lane-dense L
    w_spec = pl.BlockSpec((Cout, 3 * Cin), lambda n: (0, 0))

    # --- Pass 1: per-batch partial BN statistics (tiny packed output, fully parallel) ---
    stats = pl.pallas_call(
        conv_stats_kernel,
        grid=(N,),
        in_specs=[x_spec, w_spec],
        out_specs=pl.BlockSpec((None, Cout, 2), lambda n: (n, 0, 0)),
        out_shape=jax.ShapeDtypeStruct((N, Cout, 2), jnp.float32),
        compiler_params=cparams,
    )(x_ncl, wpk)

    # Fold BN (training-mode biased batch stats) into scale/shift; fold scale into weights.
    cnt = jnp.float32(N * L)
    mean = jnp.sum(stats[:, :, 0], axis=0) / cnt                                  # (Cout,)
    var = jnp.maximum(jnp.sum(stats[:, :, 1], axis=0) / cnt - mean * mean, 0.0)   # (Cout,)
    scale = gamma * jax.lax.rsqrt(var + BN_EPS)                                   # (Cout,)
    shift = beta - mean * scale                                                   # (Cout,)
    w2 = wpk * scale[:, None]            # tiny (Cout, 3*Cin) op; NOT the big tensor

    # --- Pass 2: conv (recomputed) + `+shift` + LeakyReLU, lane-dense NCL output ---
    out = pl.pallas_call(
        conv_bn_act_kernel,
        grid=(N,),
        in_specs=[x_spec, w_spec,
                  pl.BlockSpec((Cout, 1), lambda n: (0, 0))],
        out_specs=pl.BlockSpec((None, Cout, L), lambda n: (n, 0, 0)),
        out_shape=jax.ShapeDtypeStruct((N, Cout, L), jnp.float32),
        compiler_params=cparams,
    )(x_ncl, w2, shift.reshape(Cout, 1))

    return out                                                # (N, Cout, L), already NCL


def _reference(x_ncl, w_torch, bias, gamma, beta):
    """Plain-JAX reference matching the PyTorch forward (training-mode BN, with bias)."""
    y = jax.lax.conv_general_dilated(
        x_ncl, w_torch, window_strides=(1,), padding=((1, 1),),
        dimension_numbers=("NCH", "OIH", "NCH"))
    y = y + bias[None, :, None]
    mean = jnp.mean(y, axis=(0, 2), keepdims=True)
    var = jnp.mean((y - mean) ** 2, axis=(0, 2), keepdims=True)
    y = (y - mean) * jax.lax.rsqrt(var + BN_EPS)
    y = y * gamma[None, :, None] + beta[None, :, None]
    return jnp.where(y >= 0, y, LEAKY_SLOPE * y)


if __name__ == "__main__":
    # Small shapes consistent with the module: (n_batch, in_channels, timesteps)
    N, C_IN, L = 2, 4, 16
    C_OUT = 2 * C_IN  # out_channels defaults to 2 * in_channels

    key = jax.random.PRNGKey(0)
    kx, kw, kb = jax.random.split(key, 3)

    x = jax.random.normal(kx, (N, C_IN, L), dtype=jnp.float32)

    # Deterministic synthetic parameters (shapes from nn.Conv1d / nn.BatchNorm1d init)
    fan_in = C_IN * 3
    bound = 1.0 / jnp.sqrt(fan_in)
    w = jax.random.uniform(kw, (C_OUT, C_IN, 3), jnp.float32, -bound, bound)
    b = jax.random.uniform(kb, (C_OUT,), jnp.float32, -bound, bound)
    gamma = jnp.ones((C_OUT,), jnp.float32)   # BatchNorm1d default weight
    beta = jnp.zeros((C_OUT,), jnp.float32)   # BatchNorm1d default bias

    out = wave_conv_layer(x, w, b, gamma, beta)
    out = jax.block_until_ready(out)

    ref = _reference(x, w, b, gamma, beta)
    assert out.shape == (N, C_OUT, L)
    assert jnp.allclose(out, ref, atol=1e-4, rtol=1e-4), "mismatch vs reference"

    print("KERNEL_OK")
</pallas_src>

<mosaic_0001>
module attributes {stable_mosaic.version = 11 : i64} {
  func.func @conv_stats_kernel(%arg0: i32, %arg1: memref<1x4x16xf32, #tpu.memory_space<vmem>>, %arg2: memref<8x12xf32, #tpu.memory_space<vmem>>, %arg3: memref<1x8x2xf32, #tpu.memory_space<vmem>>) attributes {dimension_semantics = [#tpu.dimension_semantics<parallel>], iteration_bounds = array<i64: 2>, scalar_prefetch = 0 : i64, scratch_operands = 0 : i64, tpu.core_type = #tpu.core_type<tc>, window_params = [{transform_indices = @transform_0, window_bounds = array<i64: 1, 4, 16>}, {pipeline_mode = #tpu.pipeline_mode<synchronous>, transform_indices = @transform_1, window_bounds = array<i64: 8, 12>}, {transform_indices = @transform_2, window_bounds = array<i64: 1, 8, 2>}]} {
    %c0 = arith.constant 0 : index
    %c0_0 = arith.constant 0 : index
    %c0_1 = arith.constant 0 : index
    %0 = vector.load %arg1[%c0, %c0_0, %c0_1] : memref<1x4x16xf32, #tpu.memory_space<vmem>>, vector<1x4x16xf32>
    %1 = vector.shape_cast %0 : vector<1x4x16xf32> to vector<4x16xf32>
    %cst = arith.constant 0.000000e+00 : f32
    %2 = vector.broadcast %cst : f32 to vector<4x1xf32>
    %3 = vector.extract_strided_slice %1 {offsets = [0, 0], sizes = [4, 15], strides = [1, 1]} : vector<4x16xf32> to vector<4x15xf32>
    %4 = tpu.concatenate %2, %3 in 1 : vector<4x1xf32>, vector<4x15xf32> -> vector<4x16xf32>
    %5 = vector.extract_strided_slice %1 {offsets = [0, 1], sizes = [4, 15], strides = [1, 1]} : vector<4x16xf32> to vector<4x15xf32>
    %6 = tpu.concatenate %5, %2 in 1 : vector<4x15xf32>, vector<4x1xf32> -> vector<4x16xf32>
    %7 = tpu.concatenate %4, %1, %6 in 0 : vector<4x16xf32>, vector<4x16xf32>, vector<4x16xf32> -> vector<12x16xf32>
    %c0_2 = arith.constant 0 : index
    %c0_3 = arith.constant 0 : index
    %8 = vector.load %arg2[%c0_2, %c0_3] : memref<8x12xf32, #tpu.memory_space<vmem>>, vector<8x12xf32>
    %cst_4 = arith.constant dense<0.000000e+00> : vector<8x16xf32>
    %9 = tpu.matmul %8, %7, %cst_4 {dimension_numbers = #tpu.dot_dimension_numbers<[1], [0], [0], [1], [0, 0, 1, 1], [], []>} : vector<8x12xf32>, vector<12x16xf32>, vector<8x16xf32> -> vector<8x16xf32>
    %cst_5 = arith.constant dense<0.000000e+00> : vector<8xf32>
    %10 = vector.multi_reduction <add>, %9, %cst_5 [1] : vector<8x16xf32> to vector<8xf32>
    %11 = vector.shape_cast %10 : vector<8xf32> to vector<8x1xf32>
    %12 = arith.mulf %9, %9 : vector<8x16xf32>
    %cst_6 = arith.constant dense<0.000000e+00> : vector<8xf32>
    %13 = vector.multi_reduction <add>, %12, %cst_6 [1] : vector<8x16xf32> to vector<8xf32>
    %14 = vector.shape_cast %13 : vector<8xf32> to vector<8x1xf32>
    %15 = tpu.concatenate %11, %14 in 1 : vector<8x1xf32>, vector<8x1xf32> -> vector<8x2xf32>
    %c0_7 = arith.constant 0 : index
    %c0_8 = arith.constant 0 : index
    %c0_9 = arith.constant 0 : index
    %16 = vector.load %arg3[%c0_7, %c0_8, %c0_9] : memref<1x8x2xf32, #tpu.memory_space<vmem>>, vector<1x8x2xf32>
    %17 = vector.shape_cast %16 : vector<1x8x2xf32> to vector<8x2xf32>
    %18 = vector.shape_cast %15 : vector<8x2xf32> to vector<1x8x2xf32>
    tpu.vector_store %arg3[%c0_7, %c0_8, %c0_9], %18 {strides = array<i32>} : memref<1x8x2xf32, #tpu.memory_space<vmem>>, vector<1x8x2xf32>,
    return
  }
  func.func @transform_0(%arg0: i32) -> (i32, i32, i32) {
    %c0_i32 = arith.constant 0 : i32
    %c0_i32_0 = arith.constant 0 : i32
    %c0_i32_1 = arith.constant 0 : i32
    return %arg0, %c0_i32, %c0_i32_0 : i32, i32, i32
  }
  func.func @transform_1(%arg0: i32) -> (i32, i32) {
    %c0_i32 = arith.constant 0 : i32
    %c0_i32_0 = arith.constant 0 : i32
    %c0_i32_1 = arith.constant 0 : i32
    return %c0_i32, %c0_i32_0 : i32, i32
  }
  func.func @transform_2(%arg0: i32) -> (i32, i32, i32) {
    %c0_i32 = arith.constant 0 : i32
    %c0_i32_0 = arith.constant 0 : i32
    %c0_i32_1 = arith.constant 0 : i32
    return %arg0, %c0_i32, %c0_i32_0 : i32, i32, i32
  }
}

</mosaic_0001>

<bundles_post_ra>
// kernel: tpu_custom_call.1
= control target key start
LH: loop header
LB: loop body
LE: loop exit
PB: predicated region body
PF: predicated region fallthrough
CT: control target
= control target key end

     0   :  { %7 = vsyncpa [#allocation3], 0  ;;  %s595_s0 = inlined_call_operand.hbm [shape: f32[2,4,16], index: 0, kind: input, shape index: {}]   ;;  %s596_s1 = inlined_call_operand.hbm [shape: f32[8,12], index: 1, kind: input, shape index: {}]   ;;  %s597_s2 = inlined_call_operand.vmem [shape: f32[2,8,2], index: 2, kind: output, shape index: {}]  }
   0x1   :  { %9 = vsyncpa [#allocation3 + $0x1], 0 }
   0x2   :  { %10 = vsyncpa [#allocation5], 0  ;;  %s490_s9 = smov 0   ;;  %s492_s10 = smov 0  }
   0x3   :  { %s494_s11 = smov 0   ;;  %s496_s12 = smov 0  }
   0x4 LB: > { %s509_s13 = sadd.s32 4294967295, %s470_s12   ;;  %p36_p0 = scmp.ne.s32.totalorder %s462_s10, %s458_s9  ;;  %s470_s12 = sphi %s496_s12, %s604_s12   ;;  %s466_s11 = sphi %s494_s11, %s603_s11   ;;  %s462_s10 = sphi %s492_s10, %s602_s10   ;;  %s458_s9 = sphi %s490_s9, %s601_s9  }
   0x5   : > { %p37_p1 = scmp.eq.s32.totalorder %s509_s13, 0  ;;  %p307_p2 = scmp.ge.s32.totalorder %s470_s12, 1 }
   0x6   : > { %p94_p3 = scmp.lt.s32.totalorder %s470_s12, 3  ;;  %s106_s17 = sshll.u32 %s596_s1, 4  ;;  %s107_s17 = int_to_ptr.hbm [resolvable:$true] %s106_s17 }
   0x7   : > { %p517_p4 = por %p37_p1, %p36_p0  ;;  %s472_s19 = smov [#allocation4]  }
   0x8   : > { %p524_p5 = pnand %p307_p2, %p94_p3  ;;  %s108_s20 = sshll.u32 %s472_s19, 4  ;;  %s109_s20 = int_to_ptr.vmem [resolvable:$true] %s108_s20 }
   0x9   : > { %s533_s21 = sadd.s32 1, %s470_s12   ;;  %s23_s22 = sadd.s32 1, %s466_s11 }
   0xa   : > { %p326_p6 = pneg %p524_p5  ;;  %s20_s23 = ssub.s32 %s470_s12, %s533_s21 }
   0xb   : > { %p21_p8 = scmp.eq.s32.totalorder %s20_s23, 0  ;;  %p30_p9 = scmp.ne.s32.totalorder %s466_s11, %s462_s10 }
   0xc   : > { %p327_p7 = pnand %p326_p6, %p37_p1  ;;  %p31_p10 = scmp.eq.s32.totalorder %s470_s12, 0 }
   0xd   : > { %p335_p11 = scmp.lt.s32.totalorder %s470_s12, 2  ;;  %s119_s25 = sand.u32 1, %s466_s11  }
   0xe   : > { %329 = dma.hbm_to_vmem [thread:$0]  (!%p327_p7), %s107_s17, 128, %s109_s20, [#allocation5]  }
   0xf   : > { %s543_s24 = scalar_select %p21_p8, %s466_s11, %s23_s22  }
  0x10   : > { %p32_p12 = por %p31_p10, %p30_p9  ;;  %s310_s26 = sshll.u32 %s119_s25, 2 }
  0x11   : > { %s311_s27 = sshll.u32 %s470_s12, 2  ;;  %s123_s3 = scalar_lea.vmem [#allocation2], %s310_s26 }
  0x12   : > { %s127_s30 = scalar_lea.hbm %s595_s0, %s311_s27  ;;  %s131_s4 = sshll.u32 %s123_s3, 4  ;;  %s132_s4 = int_to_ptr.vmem [resolvable:$true] %s131_s4 }
  0x13   : > { %s129_s5 = sshll.u32 %s127_s30, 4  ;;  %p550_p13 = pnand %p335_p11, %p32_p12  ;;  %s130_s5 = int_to_ptr.hbm [resolvable:$true] %s129_s5 }
  0x14   : > { %s120_s7 = scalar_lea.sflag [#allocation3], %s119_s25  ;;  %s402_s8 = sshra.s32 %s130_s5, 4  ;;  %s403_s8 = int_to_ptr.hbm [resolvable:$true] %s402_s8 }
  0x15   : > { %s404_s9 = scalar_lea.hbm %s403_s8, 4  ;;  %p406_p2 = pneg %p550_p13 }
  0x16   : > { %p405_p0 = scmp.ne.s32.totalorder %s403_s8, %s404_s9  ;;  %s409_s16 = scalar_lea.hbm %s595_s0, 8 }
  0x17   : > { %p410_p7 = scmp.lt.s32.totalorder %s403_s8, %s595_s0  ;;  %p411_p8 = scmp.lt.s32.totalorder %s409_s16, %s404_s9 }
  0x18   : > { %p407_p3 = pnand %p406_p2, %p405_p0 }
  0x19   : > { %p412_p9 = por %p411_p8, %p410_p7 }
  0x1a   : > { %p408_p6 = pneg %p407_p3 }
  0x1c   : > { %p413_p10 = pnand %p412_p9, %p408_p6 }
  0x1e   : > { %416 = shalt.err (!%p413_p10)
}
  0x1f   : > { %333 = dma.hbm_to_vmem [thread:$0]  (!%p550_p13), %s130_s5, 64, %s132_s4, %s120_s7  }
  0x20   : > { %140 = sbr.rel (%p524_p5) target bundleno = 420 (0x1a4), region = 28  ;;  %s142_s20 = sand.u32 (!%p524_p5), 1, %s462_s10  }
  0x21   : > { %s313_s22 = sshll.u32 (!%p524_p5), %s142_s20, 2  ;;  %s143_s23 = scalar_lea.sflag (!%p524_p5), [#allocation3], %s142_s20 }
  0x22   : > { %s146_s25 = scalar_lea.vmem (!%p524_p5), [#allocation2], %s313_s22 }
  0x25   : > { %449 = dma.done.wait (%p517_p4), %s143_s23, 64  }
  0x26   : > { %451 = vsyncadd (%p517_p4), %s143_s23, 4294967232 }
  0x27   : > { %453 = dma.done.wait (%p37_p1), [#allocation5], 128  }
  0x28   : > { %455 = vsyncadd (%p37_p1), [#allocation5], 4294967168  ;;  %v176_v0 = vld [vmem:[%s146_s25] sm:$0xf]  ;;  %s473_s18 = smov 127   ;;  %s474_s26 = smov 1  }
  0x29   : > { %183 = vrot.lane.b32.xlu0 %v176_v0, %s473_s18  ;;  %vm186_vm0 = vcmask 121856   ;;  %vm190_vm1 = vcmask 1043456   ;;  %v188_v3 = vrot.slane %v176_v0, 4  ;;  %vm181_vm2 = vcmask 7168   ;;  %v192_v6 = vld [vmem:[#allocation4] sm:$0xff]  ;;  %p172_p1 = scmp.lt.s32.totalorder %s509_s13, 1 }
  0x2a   : > { %vm193_vm3 = vcmask 97280   ;;  %vm220_vm4 = vcmask 130048   ;;  %vm229_vm5 = vcmask 15360  }
  0x2b   : > { %s606_s13 = smov (!%p172_p1, %s509_s13), 1 }
  0x2c   : > { %s315_s14 = sshll.u32 %s606_s13, 3 }
  0x2d   : > { %s175_s29 = scalar_lea.vmem %s597_s2, %s315_s14 }
  0x31   : > { %178 = vrot.lane.b32.xlu0 %v176_v0, %s474_s26 }
  0x9b   : > { %v184_v1 = vpop.permute.xlu0 %183 }
  0x9c   : > { %v187_v2 = vsel %vm186_vm0, %v184_v1, 0.0 }
  0x9d   : > { %316 = vmatpush.msk.msra.mxu0 %vm190_vm1, %v187_v2 }
  0xa3   : > { %v179_v4 = vpop.permute.xlu0 %178 }
  0xa4   : > { %v182_v5 = vsel %vm181_vm2, 0.0, %v179_v4 }
  0xa5   : > { %v191_v7 = vsel %vm190_vm1, %v182_v5, %v188_v3 }
  0xa6   : > { %215 = vmatpush.msra.mxu0 %v191_v7 }
  0xa7   : > { %317 = vmatmul.msk.f32.vlgmr.msra.gmra.mxu0 %vm193_vm3, %v192_v6 }
 0x124   : > { %v217_v8 = vpop.f32.mrf.mxu0 }
 0x125   : > { %v221_v9 = vsel %vm220_vm4, %v217_v8, 0.0  ;;  %v224_v10 = vmul.f32 %v217_v8, %v217_v8 }
 0x126   : > { %222 = vadd.xlane.f32.xlu1 %v221_v9 }
 0x127   : > { %v225_v11 = vsel %vm220_vm4, %v224_v10, 0.0 }
 0x12e   : > { %226 = vadd.xlane.f32.xlu1 %v225_v11 }
 0x199   : > { %v223_v12 = vpop.xlane.xlu1 %222 }
 0x1a1   : > { %v227_v13 = vpop.xlane.xlu1 %226 }
 0x1a2   : > { %v228_v14 = vsel %vm181_vm2, %v223_v12, %v227_v13 }
 0x1a3   : > { %230 = vst.msk [vmem:[%s175_s29] sm:$0xff] %vm229_vm5, %v228_v14 }
 0x1a4 PF: > { %p13_p4 = scmp.ge.s32.totalorder %s533_s21, 4   ;;  %s601_s9 = smov %s462_s10 }
 0x1a5   : > { %s602_s10 = smov %s466_s11  ;;  %s603_s11 = smov %s543_s24 }
 0x1a6   : > { %s604_s12 = smov %s533_s21  ;;  %15 = sbr.rel (!%p13_p4) target bundleno = 4 (0x4), region = 72 }
 0x1ab   :  { %250 = vsyncpa [#allocation3], 1 }
 0x1ac   :  { %252 = vsyncpa [#allocation3 + $0x1], 1 }
 0x1ad   :  { %253 = vsyncpa [#allocation5], 1 }

</bundles_post_ra>
